<compile_context>
chip_gen: v7x
topology: tpu7x:2x2x1
jax: 0.10.0
libtpu: 0.0.40
codegen_flags: <defaults>
</compile_context>

<pallas_src>
import math
from functools import partial

import numpy as np

import jax
import jax.numpy as jnp
from jax.experimental import pallas as pl
from jax.experimental.pallas import tpu as pltpu


def _vmem_capacity_bytes():
    """Physical VMEM per TensorCore (v5e/v6e: 128 MiB, v7x: 64 MiB)."""
    try:
        info = pltpu.get_tpu_info()
        cap = int(getattr(info, "vmem_capacity_bytes", 0))
        if cap > 0:
            return cap
    except Exception:
        pass
    return 64 << 20  # conservative (v7x-sized) fallback


def _gelu_exact_f32(h):
    # Exact GELU (matches torch.nn.GELU default, approximate='none'), in f32.
    # TODO(synk): on v6e/v7x a bf16 bias+GELU (bf16 VPU/EUP) or tanh-approx GELU
    # halves VALU work if a bundle dump shows VALU as the binding slot.
    return 0.5 * h * (1.0 + jax.lax.erf(h * jnp.float32(1.0 / math.sqrt(2.0))))


def _ffn_resident_kernel(x_ref, w1_ref, b1_ref, w2_ref, b2_ref, o_ref, *,
                         compute_dtype):
    xv = x_ref[...]
    if xv.dtype != compute_dtype:
        xv = xv.astype(compute_dtype)
    # fc1: (TM, D) @ (D, F) -> f32 on the MXU.
    h = jnp.dot(xv, w1_ref[...], preferred_element_type=jnp.float32)
    h = _gelu_exact_f32(h + b1_ref[...])
    # fc2: (TM, F) @ (F, D) -> f32 on the MXU.
    out = jnp.dot(h.astype(compute_dtype), w2_ref[...],
                  preferred_element_type=jnp.float32)
    o_ref[...] = (out + b2_ref[...]).astype(o_ref.dtype)


def _ffn_streamed_kernel(x_ref, w1_ref, b1_ref, w2_ref, b2_ref, o_ref, acc_ref,
                         *, compute_dtype):
    f = pl.program_id(1)

    @pl.when(f == 0)
    def _():
        acc_ref[...] = jnp.zeros_like(acc_ref)

    xv = x_ref[...]
    if xv.dtype != compute_dtype:
        xv = xv.astype(compute_dtype)
    # fc1 chunk: (TM, D) @ (D, TF) -> f32.
    h = jnp.dot(xv, w1_ref[...], preferred_element_type=jnp.float32)
    h = _gelu_exact_f32(h + b1_ref[...])
    # fc2 partial: (TM, TF) @ (TF, D), accumulated over the F grid axis.
    acc_ref[...] += jnp.dot(h.astype(compute_dtype), w2_ref[...],
                            preferred_element_type=jnp.float32)

    @pl.when(f == pl.num_programs(1) - 1)
    def _():
        o_ref[...] = (acc_ref[...] + b2_ref[...]).astype(o_ref.dtype)


def feed_forward_pallas(x, w1, b1, w2, b2, *, compute_dtype=jnp.bfloat16,
                        tm_target=1024, vmem_fraction=0.85):
    """x: (B, T, D); w1: (D, F); b1: (F,); w2: (F, D); b2: (D,).

    compute_dtype: dtype fed to the MXU (default bf16 — the fast path on
    v5e/v6e/v7x). Accumulation, bias adds and GELU remain f32. Pass
    jnp.float32 for bit-accurate results vs. an f32 reference.
    """
    B, T, D = x.shape
    F = w1.shape[1]
    M = B * T
    compute_dtype = np.dtype(compute_dtype)

    # Weights: cast only if not already stored in compute_dtype (store bf16
    # weights once at load time to skip this full HBM pass).
    w1c = w1 if w1.dtype == compute_dtype else w1.astype(compute_dtype)
    w2c = w2 if w2.dtype == compute_dtype else w2.astype(compute_dtype)
    b1_2d = b1.reshape(1, F).astype(jnp.float32)
    b2_2d = b2.reshape(1, D).astype(jnp.float32)
    # x keeps its own dtype; cast per-tile inside the kernel (no extra HBM pass).
    x2d = x.reshape(M, D)

    cbytes = compute_dtype.itemsize
    xbytes = np.dtype(x.dtype).itemsize
    obytes = xbytes

    cap = _vmem_capacity_bytes()
    budget = int(vmem_fraction * cap)
    headroom = 4 << 20

    # Row tile: as large as comfortably fits; multiple of 8 unless full-extent.
    tm_full = M if M <= tm_target else (tm_target // 8) * 8

    def _io_bytes(tm):
        # double-buffered x/out tiles + (tm, F) f32 intermediate + biases.
        return (2 * tm * D * xbytes + 2 * tm * D * obytes + tm * F * 4
                + 2 * (F + D) * 4)

    # w1 + w2, conservatively counted with 2 pipeline buffers each.
    weight_resident_bytes = 4 * D * F * cbytes

    resident_tm = None
    for tm_cand in (tm_full, 512, 256, 128):
        tm_cand = min(tm_cand, tm_full)
        if tm_cand <= 0:
            continue
        if weight_resident_bytes + _io_bytes(tm_cand) + headroom <= budget:
            resident_tm = tm_cand
            break

    if resident_tm is not None:
        # ---------------- Path A: weights resident in VMEM ----------------
        TM = resident_tm
        grid = (pl.cdiv(M, TM),)
        vmem_needed = weight_resident_bytes + _io_bytes(TM)
        vmem_limit = int(min(int(0.9 * cap),
                             max(vmem_needed + headroom, 32 << 20)))
        cost = pl.CostEstimate(
            flops=int(4 * M * D * F),              # two matmuls, 2*M*D*F each
            transcendentals=int(M * F),            # erf per fc1 output element
            bytes_accessed=int(M * D * xbytes + 2 * D * F * cbytes
                               + (F + D) * 4 + M * D * obytes),
        )
        out2d = pl.pallas_call(
            partial(_ffn_resident_kernel, compute_dtype=compute_dtype),
            out_shape=jax.ShapeDtypeStruct((M, D), x.dtype),
            grid_spec=pltpu.PrefetchScalarGridSpec(
                num_scalar_prefetch=0,
                grid=grid,
                in_specs=[
                    pl.BlockSpec((TM, D), lambda i: (i, 0)),   # x rows
                    pl.BlockSpec((D, F), lambda i: (0, 0)),    # w1 (resident)
                    pl.BlockSpec((1, F), lambda i: (0, 0)),    # b1 (resident)
                    pl.BlockSpec((F, D), lambda i: (0, 0)),    # w2 (resident)
                    pl.BlockSpec((1, D), lambda i: (0, 0)),    # b2 (resident)
                ],
                out_specs=pl.BlockSpec((TM, D), lambda i: (i, 0)),
            ),
            compiler_params=pltpu.CompilerParams(
                dimension_semantics=("parallel",),
                vmem_limit_bytes=vmem_limit,
            ),
            cost_estimate=cost,
        )(x2d, w1c, b1_2d, w2c, b2_2d)
        return out2d.reshape(B, T, D)

    # ---------------- Path B: stream w1/w2 in F chunks ----------------
    TM = tm_full
    fixed = (2 * TM * D * xbytes + 2 * TM * D * obytes   # x/out tiles
             + TM * D * 4                                 # f32 accumulator
             + 2 * D * 4 + headroom)                      # b2 + slack
    # per-unit-of-TF bytes: w1 chunk (2*D*TF) + w2 chunk (2*TF*D) double-buffered,
    # (TM, TF) f32 intermediate, b1 chunk double-buffered.
    per_tf = 4 * D * cbytes + TM * 4 + 8
    tf_cap = max((budget - fixed) // per_tf, 128)
    tf_cap = int(min(tf_cap, F))
    if F % 128 != 0 or tf_cap >= F:
        TF = F
    else:
        tf_cap = (tf_cap // 128) * 128
        TF = 128
        for cand in range(tf_cap, 127, -128):
            if F % cand == 0:          # TF must divide F: no padded accumulation
                TF = cand
                break

    grid = (pl.cdiv(M, TM), F // TF)
    grid_m = grid[0]
    vmem_needed = fixed - headroom + per_tf * TF
    vmem_limit = int(min(int(0.9 * cap), max(vmem_needed + headroom, 32 << 20)))
    cost = pl.CostEstimate(
        flops=int(4 * M * D * F),
        transcendentals=int(M * F),
        # Weights are re-streamed once per M tile in this path.
        bytes_accessed=int(M * D * xbytes + grid_m * 2 * D * F * cbytes
                           + grid_m * (F + D) * 4 + M * D * obytes),
    )
    out2d = pl.pallas_call(
        partial(_ffn_streamed_kernel, compute_dtype=compute_dtype),
        out_shape=jax.ShapeDtypeStruct((M, D), x.dtype),
        grid_spec=pltpu.PrefetchScalarGridSpec(
            num_scalar_prefetch=0,
            grid=grid,
            in_specs=[
                pl.BlockSpec((TM, D), lambda i, f: (i, 0)),   # x rows
                pl.BlockSpec((D, TF), lambda i, f: (0, f)),   # w1 chunk
                pl.BlockSpec((1, TF), lambda i, f: (0, f)),   # b1 chunk
                pl.BlockSpec((TF, D), lambda i, f: (f, 0)),   # w2 chunk
                pl.BlockSpec((1, D), lambda i, f: (0, 0)),    # b2
            ],
            out_specs=pl.BlockSpec((TM, D), lambda i, f: (i, 0)),
            scratch_shapes=[pltpu.VMEM((TM, D), jnp.float32)],
        ),
        compiler_params=pltpu.CompilerParams(
            dimension_semantics=("parallel", "arbitrary"),
            vmem_limit_bytes=vmem_limit,
        ),
        cost_estimate=cost,
    )(x2d, w1c, b1_2d, w2c, b2_2d)
    return out2d.reshape(B, T, D)


def init_params(key, input_dim, feedforward_dim):
    """Deterministic init mimicking nn.Linear (uniform +/- 1/sqrt(fan_in))."""
    k1, k2, k3, k4 = jax.random.split(key, 4)
    bound1 = 1.0 / math.sqrt(input_dim)
    bound2 = 1.0 / math.sqrt(feedforward_dim)
    # Stored already transposed relative to PyTorch's (out_features, in_features).
    w1 = jax.random.uniform(k1, (input_dim, feedforward_dim), jnp.float32,
                            minval=-bound1, maxval=bound1)
    b1 = jax.random.uniform(k2, (feedforward_dim,), jnp.float32,
                            minval=-bound1, maxval=bound1)
    w2 = jax.random.uniform(k3, (feedforward_dim, input_dim), jnp.float32,
                            minval=-bound2, maxval=bound2)
    b2 = jax.random.uniform(k4, (input_dim,), jnp.float32,
                            minval=-bound2, maxval=bound2)
    return w1, b1, w2, b2


def feed_forward_ref(x, w1, b1, w2, b2):
    h = x @ w1 + b1
    h = 0.5 * h * (1.0 + jax.lax.erf(h / jnp.sqrt(2.0)))
    return h @ w2 + b2


if __name__ == "__main__":
    # NOTE: D=32 / F=128 are toy sizes; real models should keep D a multiple of
    # 128 for lane-dense stores and full MXU K-utilization.
    batch, num_tokens, input_dim = 2, 8, 32
    feedforward_dim = input_dim * 4  # 128

    key = jax.random.PRNGKey(0)
    kx, kp = jax.random.split(key)
    x = jax.random.normal(kx, (batch, num_tokens, input_dim), dtype=jnp.float32)
    w1, b1, w2, b2 = init_params(kp, input_dim, feedforward_dim)

    ref = feed_forward_ref(x, w1, b1, w2, b2)

    # Exact f32 MXU path: bit-tight check vs reference.
    out_f32 = feed_forward_pallas(x, w1, b1, w2, b2, compute_dtype=jnp.float32)
    out_f32 = jax.block_until_ready(out_f32)
    assert out_f32.shape == (batch, num_tokens, input_dim)
    assert jnp.allclose(out_f32, ref, atol=1e-5, rtol=1e-5), "f32 path mismatch"

    # Default fast path: bf16 MXU operands (weights stored in bf16 once,
    # "load time"), f32 accumulation. Looser tolerance for bf16 rounding.
    w1b = w1.astype(jnp.bfloat16)
    w2b = w2.astype(jnp.bfloat16)
    out_bf16 = feed_forward_pallas(x, w1b, b1, w2b, b2)  # compute_dtype=bf16 default
    out_bf16 = jax.block_until_ready(out_bf16)
    assert out_bf16.shape == (batch, num_tokens, input_dim)
    assert jnp.allclose(out_bf16.astype(jnp.float32), ref, atol=5e-2, rtol=5e-2), \
        "bf16 path mismatch"

    print("KERNEL_OK")
</pallas_src>

<mosaic_0001>
module attributes {stable_mosaic.version = 11 : i64} {
  func.func @_ffn_resident_kernel(%arg0: i32, %arg1: memref<16x32xf32, #tpu.memory_space<vmem>>, %arg2: memref<32x128xf32, #tpu.memory_space<vmem>>, %arg3: memref<1x128xf32, #tpu.memory_space<vmem>>, %arg4: memref<128x32xf32, #tpu.memory_space<vmem>>, %arg5: memref<1x32xf32, #tpu.memory_space<vmem>>, %arg6: memref<16x32xf32, #tpu.memory_space<vmem>>) attributes {dimension_semantics = [#tpu.dimension_semantics<parallel>], iteration_bounds = array<i64: 1>, scalar_prefetch = 0 : i64, scratch_operands = 0 : i64, tpu.core_type = #tpu.core_type<tc>, window_params = [{transform_indices = @transform_0, window_bounds = array<i64: 16, 32>}, {pipeline_mode = #tpu.pipeline_mode<synchronous>, transform_indices = @transform_1, window_bounds = array<i64: 32, 128>}, {pipeline_mode = #tpu.pipeline_mode<synchronous>, transform_indices = @transform_2, window_bounds = array<i64: 1, 128>}, {pipeline_mode = #tpu.pipeline_mode<synchronous>, transform_indices = @transform_3, window_bounds = array<i64: 128, 32>}, {pipeline_mode = #tpu.pipeline_mode<synchronous>, transform_indices = @transform_4, window_bounds = array<i64: 1, 32>}, {transform_indices = @transform_5, window_bounds = array<i64: 16, 32>}]} {
    %c0 = arith.constant 0 : index
    %c0_0 = arith.constant 0 : index
    %0 = vector.load %arg1[%c0, %c0_0] : memref<16x32xf32, #tpu.memory_space<vmem>>, vector<16x32xf32>
    %c0_1 = arith.constant 0 : index
    %c0_2 = arith.constant 0 : index
    %1 = vector.load %arg2[%c0_1, %c0_2] : memref<32x128xf32, #tpu.memory_space<vmem>>, vector<32x128xf32>
    %cst = arith.constant dense<0.000000e+00> : vector<16x128xf32>
    %2 = tpu.matmul %0, %1, %cst {dimension_numbers = #tpu.dot_dimension_numbers<[1], [0], [0], [1], [0, 0, 1, 1], [], []>} : vector<16x32xf32>, vector<32x128xf32>, vector<16x128xf32> -> vector<16x128xf32>
    %c0_3 = arith.constant 0 : index
    %c0_4 = arith.constant 0 : index
    %3 = vector.load %arg3[%c0_3, %c0_4] : memref<1x128xf32, #tpu.memory_space<vmem>>, vector<1x128xf32>
    %4 = vector.broadcast %3 : vector<1x128xf32> to vector<16x128xf32>
    %5 = arith.addf %2, %4 : vector<16x128xf32>
    %cst_5 = arith.constant 5.000000e-01 : f32
    %6 = vector.broadcast %cst_5 : f32 to vector<16x128xf32>
    %7 = arith.mulf %6, %5 : vector<16x128xf32>
    %cst_6 = arith.constant 0.707106769 : f32
    %8 = vector.broadcast %cst_6 : f32 to vector<16x128xf32>
    %9 = arith.mulf %5, %8 : vector<16x128xf32>
    %10 = math.erf %9 : vector<16x128xf32>
    %cst_7 = arith.constant 1.000000e+00 : f32
    %11 = vector.broadcast %cst_7 : f32 to vector<16x128xf32>
    %12 = arith.addf %11, %10 : vector<16x128xf32>
    %13 = arith.mulf %7, %12 : vector<16x128xf32>
    %c0_8 = arith.constant 0 : index
    %c0_9 = arith.constant 0 : index
    %14 = vector.load %arg4[%c0_8, %c0_9] : memref<128x32xf32, #tpu.memory_space<vmem>>, vector<128x32xf32>
    %cst_10 = arith.constant dense<0.000000e+00> : vector<16x32xf32>
    %15 = tpu.matmul %13, %14, %cst_10 {dimension_numbers = #tpu.dot_dimension_numbers<[1], [0], [0], [1], [0, 0, 1, 1], [], []>} : vector<16x128xf32>, vector<128x32xf32>, vector<16x32xf32> -> vector<16x32xf32>
    %c0_11 = arith.constant 0 : index
    %c0_12 = arith.constant 0 : index
    %16 = vector.load %arg5[%c0_11, %c0_12] : memref<1x32xf32, #tpu.memory_space<vmem>>, vector<1x32xf32>
    %17 = vector.broadcast %16 : vector<1x32xf32> to vector<16x32xf32>
    %18 = arith.addf %15, %17 : vector<16x32xf32>
    %c0_13 = arith.constant 0 : index
    %c0_14 = arith.constant 0 : index
    %19 = vector.load %arg6[%c0_13, %c0_14] : memref<16x32xf32, #tpu.memory_space<vmem>>, vector<16x32xf32>
    tpu.vector_store %arg6[%c0_13, %c0_14], %18 {strides = array<i32>} : memref<16x32xf32, #tpu.memory_space<vmem>>, vector<16x32xf32>,
    return
  }
  func.func @transform_0(%arg0: i32) -> (i32, i32) {
    %c0_i32 = arith.constant 0 : i32
    %c0_i32_0 = arith.constant 0 : i32
    return %arg0, %c0_i32 : i32, i32
  }
  func.func @transform_1(%arg0: i32) -> (i32, i32) {
    %c0_i32 = arith.constant 0 : i32
    %c0_i32_0 = arith.constant 0 : i32
    %c0_i32_1 = arith.constant 0 : i32
    return %c0_i32, %c0_i32_0 : i32, i32
  }
  func.func @transform_2(%arg0: i32) -> (i32, i32) {
    %c0_i32 = arith.constant 0 : i32
    %c0_i32_0 = arith.constant 0 : i32
    %c0_i32_1 = arith.constant 0 : i32
    return %c0_i32, %c0_i32_0 : i32, i32
  }
  func.func @transform_3(%arg0: i32) -> (i32, i32) {
    %c0_i32 = arith.constant 0 : i32
    %c0_i32_0 = arith.constant 0 : i32
    %c0_i32_1 = arith.constant 0 : i32
    return %c0_i32, %c0_i32_0 : i32, i32
  }
  func.func @transform_4(%arg0: i32) -> (i32, i32) {
    %c0_i32 = arith.constant 0 : i32
    %c0_i32_0 = arith.constant 0 : i32
    %c0_i32_1 = arith.constant 0 : i32
    return %c0_i32, %c0_i32_0 : i32, i32
  }
  func.func @transform_5(%arg0: i32) -> (i32, i32) {
    %c0_i32 = arith.constant 0 : i32
    %c0_i32_0 = arith.constant 0 : i32
    return %arg0, %c0_i32 : i32, i32
  }
}

</mosaic_0001>

<bundles_post_ra>
// kernel: tpu_custom_call.1
= control target key start
LH: loop header
LB: loop body
LE: loop exit
PB: predicated region body
PF: predicated region fallthrough
CT: control target
= control target key end

     0   :  { %vm34_vm0 = vcmask 261120   ;;  %s508_s0 = inlined_call_operand.vmem [shape: f32[16,32], index: 0, kind: input, shape index: {}]   ;;  %s509_s1 = inlined_call_operand.vmem [shape: f32[32,128], index: 1, kind: input, shape index: {}]   ;;  %s510_s2 = inlined_call_operand.vmem [shape: f32[1,128], index: 2, kind: input, shape index: {}]   ;;  %s511_s3 = inlined_call_operand.vmem [shape: f32[128,32], index: 3, kind: input, shape index: {}]   ;;  %s512_s4 = inlined_call_operand.vmem [shape: f32[1,32], index: 4, kind: input, shape index: {}]   ;;  %s513_s5 = inlined_call_operand.hbm [shape: f32[16,32], index: 5, kind: output, shape index: {}]  }
   0x1   :  { %v23_v0 = vld [vmem:[%s509_s1] sm:$0xff]  ;;  %v24_v1 = vld [vmem:[%s509_s1 + $0x8] sm:$0xff]  ;;  %v25_v2 = vld [vmem:[%s509_s1 + $0x10] sm:$0xff] }
   0x2   :  { %v316_v3 = vpack.c.bf16 %v24_v1, %v23_v0  ;;  %v26_v4 = vld [vmem:[%s509_s1 + $0x18] sm:$0xff]  ;;  %v21_v5 = vld [vmem:[%s508_s0] sm:$0xff]  ;;  %v127_v8 = vld [vmem:[%s511_s3 + $0x8] sm:$0xff] }
   0x3   :  { %v320_v6 = vpack.c.bf16 %v26_v4, %v25_v2  ;;  %278 = vmatprep.mubr.msk.f32.mxu0 %vm34_vm0, %v21_v5  ;;  %v126_v7 = vld [vmem:[%s511_s3] sm:$0xff]  ;;  %v128_v9 = vld [vmem:[%s511_s3 + $0x10] sm:$0xff]  ;;  %v129_v11 = vld [vmem:[%s511_s3 + $0x18] sm:$0xff] }
   0x4   :  { %317 = vmatprep.subr.bf16.mxu0 %v316_v3  ;;  %v324_v10 = vpack.c.bf16 %v127_v8, %v126_v7  ;;  %v328_v12 = vpack.c.bf16 %v129_v11, %v128_v9  ;;  %v130_v13 = vld [vmem:[%s511_s3 + $0x20] sm:$0xff]  ;;  %v131_v14 = vld [vmem:[%s511_s3 + $0x28] sm:$0xff] }
   0x5   :  { %319 = vmatpush3.bf16.msra.mxu0 %v316_v3 }
   0x6   :  { %10 = vsyncpa [#allocation3], 0  ;;  %321 = vmatprep.subr.bf16.mxu0 %v320_v6  ;;  %325 = vmatprep.subr.bf16.mxu1 %v324_v10  ;;  %v332_v15 = vpack.c.bf16 %v131_v14, %v130_v13  ;;  %v22_v16 = vld [vmem:[%s508_s0 + $0x8] sm:$0xff]  ;;  %v132_v17 = vld [vmem:[%s511_s3 + $0x30] sm:$0xff]  ;;  %s387_s11 = smov [#allocation2]  }
   0x7   :  { %327 = vmatpush3.bf16.msra.mxu1 %v324_v10  ;;  %v133_v18 = vld [vmem:[%s511_s3 + $0x38] sm:$0xff]  ;;  %v134_v20 = vld [vmem:[%s511_s3 + $0x40] sm:$0xff]  ;;  %v135_v21 = vld [vmem:[%s511_s3 + $0x48] sm:$0xff]  ;;  %s231_s12 = sshll.u32 %s387_s11, 4  ;;  %s232_s12 = int_to_ptr.vmem [resolvable:$true] %s231_s12 }
   0x8   :  { %329 = vmatprep.subr.bf16.mxu1 %v328_v12  ;;  %v336_v19 = vpack.c.bf16 %v133_v18, %v132_v17  ;;  %v340_v22 = vpack.c.bf16 %v135_v21, %v134_v20  ;;  %v136_v23 = vld [vmem:[%s511_s3 + $0x50] sm:$0xff]  ;;  %v137_v24 = vld [vmem:[%s511_s3 + $0x58] sm:$0xff]  ;;  %v138_v26 = vld [vmem:[%s511_s3 + $0x60] sm:$0xff]  ;;  %s363_s13 = scalar_lea.vmem %s232_s12, 256  ;;  %p368_p1 = scmp.lt.s32.totalorder %s232_s12, %s232_s12 }
   0x9   :  { %323 = vmatpush3.bf16.msra.mxu0 %v320_v6  ;;  %v344_v25 = vpack.c.bf16 %v137_v24, %v136_v23  ;;  %v139_v27 = vld [vmem:[%s511_s3 + $0x68] sm:$0xff]  ;;  %v140_v29 = vld [vmem:[%s511_s3 + $0x70] sm:$0xff]  ;;  %v141_v30 = vld [vmem:[%s511_s3 + $0x78] sm:$0xff]  ;;  %p364_p0 = scmp.ne.s32.totalorder %s232_s12, %s363_s13  ;;  %p369_p2 = scmp.lt.s32.totalorder %s363_s13, %s363_s13 }
   0xa   :  { %v348_v28 = vpack.c.bf16 %v139_v27, %v138_v26  ;;  %v352_v31 = vpack.c.bf16 %v141_v30, %v140_v29  ;;  %v242_v32 = vld [vmem:[%s510_s2] ss:$0 sm:$0xff] }
   0xb   :  { %331 = vmatpush3.bf16.msra.mxu1 %v328_v12  ;;  %v245_v47 = vld [vmem:[%s512_s4] ss:$0 sm:$0xff]  ;;  %p370_p3 = por %p369_p2, %p368_p1 }
   0xc   :  { %279 = vmatmul.mubr.msk.f32.vlgmr.msra.gmra.mrb[0].mxu0 %vm34_vm0, %v22_v16  ;;  %333 = vmatprep.subr.bf16.mxu1 %v332_v15 }
   0xd   :  { %p371_p4 = pnand %p370_p3, %p364_p0 }
   0xf   :  { %335 = vmatpush3.bf16.msra.mxu1 %v332_v15 }
  0x10   :  { %337 = vmatprep.subr.bf16.mxu1 %v336_v19 }
  0x13   :  { %339 = vmatpush3.bf16.msra.mxu1 %v336_v19 }
  0x14   :  { %341 = vmatprep.subr.bf16.mxu1 %v340_v22 }
  0x17   :  { %343 = vmatpush3.bf16.msra.mxu1 %v340_v22 }
  0x18   :  { %345 = vmatprep.subr.bf16.mxu1 %v344_v25 }
  0x1b   :  { %347 = vmatpush3.bf16.msra.mxu1 %v344_v25 }
  0x1c   :  { %349 = vmatprep.subr.bf16.mxu1 %v348_v28 }
  0x1f   :  { %351 = vmatpush3.bf16.msra.mxu1 %v348_v28 }
  0x20   :  { %353 = vmatprep.subr.bf16.mxu1 %v352_v31 }
  0x23   :  { %355 = vmatpush3.bf16.msra.mxu1 %v352_v31 }
  0xdf   :  { %v280_v33 = vpop.f32.mrb[0].mxu0 }
  0xe0   :  { %v113_v34 = vadd.f32 %v280_v33, %v242_v32  ;;  %v107_v35 = vpop.f32.mrb[1].mxu0 }
  0xe1   :  { %v108_v36 = vadd.f32 %v242_v32, %v107_v35 }
  0xe2   :  { %v119_v37 = vmul.f32 0.70710677, %v113_v34  ;;  %v117_v44 = vmul.f32 0.5, %v113_v34 }
  0xe3   :  { %v118_v38 = vmul.f32 0.70710677, %v108_v36  ;;  %v116_v42 = vmul.f32 0.5, %v108_v36 }
  0xe4   :  { %359 = verf.f32 %v119_v37 }
  0xe5   :  { %361 = verf.f32 %v118_v38 }
  0xee   :  { %v360_v39 = vpop.eup %359 }
  0xef   :  { %v362_v40 = vpop.eup %361  ;;  %v123_v41 = vadd.f32 1.0, %v360_v39 }
  0xf0   :  { %v122_v43 = vadd.f32 1.0, %v362_v40 }
  0xf1   :  { %v125_v46 = vmul.f32 %v123_v41, %v117_v44 }
  0xf2   :  { %v124_v45 = vmul.f32 %v122_v43, %v116_v42 }
  0xf4   :  { %313 = vmatprep.mubr.f32.mxu1 %v124_v45 }
  0xf5   :  { %314 = vmatmul.mubr.f32.vlgmr.msra.gmra.mrb[0].mxu1 %v125_v46 }
 0x1c8   :  { %v315_v48 = vpop.f32.mrb[0].mxu1 }
 0x1c9   :  { %v221_v49 = vadd.f32 %v315_v48, %v245_v47  ;;  %v215_v50 = vpop.f32.mrb[1].mxu1 }
 0x1ca   :  { %v216_v51 = vadd.f32 %v245_v47, %v215_v50 }
 0x1cb   :  { %225 = vst.msk [vmem:[#allocation2 + $0x8] sm:$0xff] %vm34_vm0, %v221_v49 }
 0x1cc   :  { %224 = vst.msk [vmem:[#allocation2] sm:$0xff] %vm34_vm0, %v216_v51 }
 0x1cd   :  { %374 = shalt.err (!%p371_p4)
}
 0x1ce   :  { %s375_s15 = scalar_lea.hbm %s513_s5, 256 }
 0x1cf   :  { %p376_p5 = scmp.ne.s32.totalorder %s513_s5, %s375_s15  ;;  %p379_p6 = scmp.lt.u32.totalorder %s375_s15, %s513_s5 }
 0x1d1   :  { %p381_p7 = pnand %p379_p6, %p376_p5 }
 0x1d3   :  { %384 = shalt.err (!%p381_p7)
}
 0x1d4   :  { %s388_s20 = smov 128   ;;  %s389_s21 = smov 8  }
 0x1d5   :  { %237 = dma.vmem_to_hbm [thread:$0]  %s232_s12, 256, %s513_s5, [#allocation3], %s388_s20, %s388_s20, %s389_s21  }
 0x1d6   :  { %385 = dma.done.wait [#allocation3], 256  }
 0x1d7   :  { %386 = vsyncadd [#allocation3], 4294967040 }
 0x1d8   :  { %241 = vsyncpa [#allocation3], 1 }

</bundles_post_ra>
